<compile_context>
chip_gen: v7x
topology: tpu7x:2x2x1
jax: 0.10.0
libtpu: 0.0.40
codegen_flags: <defaults>
</compile_context>

<pallas_src>
import functools

import jax
import jax.numpy as jnp
from jax.experimental import pallas as pl
from jax.experimental.pallas import tpu as pltpu

LANE = 128      # vreg lane width / MXU-friendly padding for N and features
SUBLANE = 8


# ----------------------------------------------------------------------------
# Capability / sizing helpers
# ----------------------------------------------------------------------------
@functools.lru_cache(maxsize=None)
def _vmem_limit_bytes():
    """Scoped-VMEM limit: near-physical on 128 MiB parts, conservative on 64 MiB."""
    try:
        info = pltpu.get_tpu_info()
        cap = int(getattr(info, "vmem_capacity_bytes", 0)) or 128 * 1024 * 1024
    except Exception:
        cap = 128 * 1024 * 1024
    if cap >= 128 * 1024 * 1024:
        # v5e/v6e class: leave only modest headroom.
        return min(cap - 16 * 1024 * 1024, 120 * 1024 * 1024)
    # v7x class (64 MiB physical): stay conservative.
    return max(32 * 1024 * 1024, int(cap * 3 // 4))


@functools.lru_cache(maxsize=None)
def _buffered_single_ok():
    """Probe once whether pipeline_mode=pl.Buffered(1) compiles on this JAX/TPU."""
    try:
        def k(x_ref, o_ref):
            o_ref[...] = x_ref[...]

        out = pl.pallas_call(
            k,
            out_shape=jax.ShapeDtypeStruct((8, 128), jnp.float32),
            grid=(1,),
            in_specs=[pl.BlockSpec((8, 128), lambda i: (0, 0),
                                   pipeline_mode=pl.Buffered(1))],
            out_specs=pl.BlockSpec((8, 128), lambda i: (0, 0)),
        )(jnp.zeros((8, 128), jnp.float32))
        jax.block_until_ready(out)
        return True
    except Exception:
        return False


def _invariant_spec(shape, index_map):
    """BlockSpec for a grid-invariant operand: single-buffer it if supported."""
    if _buffered_single_ok():
        return pl.BlockSpec(shape, index_map, pipeline_mode=pl.Buffered(1))
    return pl.BlockSpec(shape, index_map)


def _pad2(a, rmult, cmult):
    r, c = a.shape
    pr, pc = (-r) % rmult, (-c) % cmult
    if pr or pc:
        a = jnp.pad(a, ((0, pr), (0, pc)))
    return a


def _pad_cols(a, cmult, value=0.0):
    pc = (-a.shape[-1]) % cmult
    if pc:
        a = jnp.pad(a, ((0, 0), (0, pc)), constant_values=value)
    return a


def _plan_layer(n_pad, fin_pad, fout_pad, out_bytes, force_kstream):
    """Pick (path, tn, tk) under the per-core VMEM budget.

    Accounts for the real buffer count of grid-invariant operands (2x when
    Buffered(1) is unsupported) and prefers row tiles that are multiples of 128
    and leave an even number (>= 2) of grid steps for megacore balance.
    """
    nbuf_inv = 1 if _buffered_single_ok() else 2
    budget = int(0.85 * _vmem_limit_bytes())

    def tile_cands(cap):
        c = [d for d in range(LANE, min(n_pad, cap) + 1, LANE) if n_pad % d == 0]
        return sorted(c, reverse=True) or [n_pad]

    def order_by_megacore(cands):
        even = [t for t in cands if (n_pad // t) >= 2 and (n_pad // t) % 2 == 0]
        rest = [t for t in cands if t not in even]
        return even + rest

    if not force_kstream:
        resident = nbuf_inv * (n_pad * fout_pad * 2        # H_neigh (bf16)
                               + fin_pad * fout_pad * 2    # W_self (bf16)
                               + 2 * fout_pad * 4)         # BN scale/shift
        for tn in order_by_megacore(tile_cands(1024)):
            stream = 2 * (tn * n_pad                       # A rows (int8)
                          + tn * fin_pad * 2               # X rows (bf16)
                          + tn * 4                         # 1/deg rows
                          + tn * fout_pad * out_bytes)     # output rows
            if resident + stream <= budget:
                return "resident", tn, None

    # K-streaming fallback: bounded VMEM regardless of N (default path when the
    # resident H_neigh overflows, e.g. large N on v7x's 64 MiB VMEM).
    resident = nbuf_inv * (fin_pad * fout_pad * 2 + 2 * fout_pad * 4)
    for tn in order_by_megacore(tile_cands(2048)):
        for tk in tile_cands(4096):
            stream = 2 * (tn * tk                          # A block (int8)
                          + tk * fout_pad * 2              # H_neigh chunk (bf16)
                          + tn * fin_pad * 2               # X rows (bf16)
                          + tn * 4
                          + tn * fout_pad * out_bytes)
            acc = tn * fout_pad * 4
            if resident + stream + acc <= budget:
                return "kstream", tn, tk
    return "kstream", LANE, LANE


# ----------------------------------------------------------------------------
# Kernels
# ----------------------------------------------------------------------------
def _sage_project_kernel(x_ref, wn_ref, hn_ref):
    """H_neigh = X @ W_neigh for one row block (bf16 in, f32 accum, bf16 out)."""
    hn = jnp.dot(x_ref[...], wn_ref[...], preferred_element_type=jnp.float32)
    hn_ref[...] = hn.astype(hn_ref.dtype)


def _activation(y, sc, sh, mode, valid_cols):
    if mode == "hidden":
        # Eval-mode BatchNorm1d folded to scale/shift, then ReLU.
        y = y * sc + sh
        y = jnp.maximum(y, 0.0)
    else:  # "output": masked log_softmax over the (padded) feature axis
        if valid_cols < y.shape[-1]:
            col = jax.lax.broadcasted_iota(jnp.int32, y.shape, 1)
            y = jnp.where(col < valid_cols, y, -1e30)
        m = jnp.max(y, axis=-1, keepdims=True)
        y = y - m
        lse = jnp.log(jnp.sum(jnp.exp(y), axis=-1, keepdims=True))
        y = y - lse
    return y


def _combine_resident_kernel(a_ref, hn_ref, x_ref, ws_ref, dinv_ref,
                             sc_ref, sh_ref, o_ref, *, mode, valid_cols):
    """Resident-H_neigh combine: Y = X@W_self + (A@H_n)/deg (+ activation)."""
    a = a_ref[...].astype(jnp.float32).astype(jnp.bfloat16)   # int8 0/1 -> bf16
    neigh = jnp.dot(a, hn_ref[...], preferred_element_type=jnp.float32)
    neigh = neigh * dinv_ref[...]                              # exact f32 mean
    y = jnp.dot(x_ref[...], ws_ref[...], preferred_element_type=jnp.float32) + neigh
    y = _activation(y, sc_ref[...], sh_ref[...], mode, valid_cols)
    o_ref[...] = y.astype(o_ref.dtype)


def _combine_kstream_kernel(a_ref, hn_ref, x_ref, ws_ref, dinv_ref,
                            sc_ref, sh_ref, o_ref, acc_ref, *, mode, valid_cols):
    """K-streaming combine: accumulate A@H_n over source chunks, finalize at k==last."""
    k = pl.program_id(1)

    @pl.when(k == 0)
    def _():
        acc_ref[...] = jnp.zeros_like(acc_ref)

    a = a_ref[...].astype(jnp.float32).astype(jnp.bfloat16)   # int8 0/1 -> bf16
    acc_ref[...] += jnp.dot(a, hn_ref[...], preferred_element_type=jnp.float32)

    @pl.when(k == pl.num_programs(1) - 1)
    def _():
        neigh = acc_ref[...] * dinv_ref[...]
        y = jnp.dot(x_ref[...], ws_ref[...],
                    preferred_element_type=jnp.float32) + neigh
        y = _activation(y, sc_ref[...], sh_ref[...], mode, valid_cols)
        o_ref[...] = y.astype(o_ref.dtype)


# ----------------------------------------------------------------------------
# Layer wrapper
# ----------------------------------------------------------------------------
def sage_layer(a_i8, deg_inv, x, w_self, w_neigh, bn_scale, bn_shift, *,
               mode, valid_cols, out_dtype,
               force_kstream=False, tn=None, tk=None):
    """One fused SAGEConv(+BN+ReLU | +log_softmax) layer on padded operands."""
    n_pad, fin_pad = x.shape
    fout_pad = w_self.shape[1]
    assert a_i8.shape == (n_pad, n_pad)
    assert n_pad % LANE == 0 and fin_pad % LANE == 0 and fout_pad % LANE == 0

    out_bytes = jnp.dtype(out_dtype).itemsize
    path, tn_auto, tk_auto = _plan_layer(n_pad, fin_pad, fout_pad, out_bytes,
                                         force_kstream)
    if tn is None:
        tn = tn_auto
    if tk is None:
        tk = tk_auto
    assert n_pad % tn == 0

    cparams_1d = pltpu.CompilerParams(
        dimension_semantics=("parallel",),
        vmem_limit_bytes=_vmem_limit_bytes())

    # ---- pass 1: neighbor projection H_n = X @ W_neigh (bf16 out) ----
    hn = pl.pallas_call(
        _sage_project_kernel,
        out_shape=jax.ShapeDtypeStruct((n_pad, fout_pad), jnp.bfloat16),
        grid_spec=pltpu.PrefetchScalarGridSpec(
            num_scalar_prefetch=0,
            grid=(n_pad // tn,),
            in_specs=[
                pl.BlockSpec((tn, fin_pad), lambda i: (i, 0)),           # X rows
                _invariant_spec((fin_pad, fout_pad), lambda i: (0, 0)),  # W_neigh
            ],
            out_specs=pl.BlockSpec((tn, fout_pad), lambda i: (i, 0)),
        ),
        compiler_params=cparams_1d,
    )(x, w_neigh)

    # ---- pass 2: aggregation + fused self projection + activation ----
    if path == "resident":
        kernel = functools.partial(_combine_resident_kernel,
                                   mode=mode, valid_cols=valid_cols)
        y = pl.pallas_call(
            kernel,
            out_shape=jax.ShapeDtypeStruct((n_pad, fout_pad), out_dtype),
            grid_spec=pltpu.PrefetchScalarGridSpec(
                num_scalar_prefetch=0,
                grid=(n_pad // tn,),
                in_specs=[
                    pl.BlockSpec((tn, n_pad), lambda i: (i, 0)),              # A rows (int8)
                    _invariant_spec((n_pad, fout_pad), lambda i: (0, 0)),     # H_neigh resident
                    pl.BlockSpec((tn, fin_pad), lambda i: (i, 0)),            # X rows
                    _invariant_spec((fin_pad, fout_pad), lambda i: (0, 0)),   # W_self
                    pl.BlockSpec((tn, 1), lambda i: (i, 0)),                  # 1/deg rows
                    _invariant_spec((1, fout_pad), lambda i: (0, 0)),         # BN scale
                    _invariant_spec((1, fout_pad), lambda i: (0, 0)),         # BN shift
                ],
                out_specs=pl.BlockSpec((tn, fout_pad), lambda i: (i, 0)),
            ),
            compiler_params=cparams_1d,
        )(a_i8, hn, x, w_self, deg_inv, bn_scale, bn_shift)
    else:
        assert n_pad % tk == 0
        kernel = functools.partial(_combine_kstream_kernel,
                                   mode=mode, valid_cols=valid_cols)
        cparams_2d = pltpu.CompilerParams(
            dimension_semantics=("parallel", "arbitrary"),
            vmem_limit_bytes=_vmem_limit_bytes())
        y = pl.pallas_call(
            kernel,
            out_shape=jax.ShapeDtypeStruct((n_pad, fout_pad), out_dtype),
            grid_spec=pltpu.PrefetchScalarGridSpec(
                num_scalar_prefetch=0,
                grid=(n_pad // tn, n_pad // tk),
                in_specs=[
                    pl.BlockSpec((tn, tk), lambda i, k: (i, k)),                 # A block (int8)
                    pl.BlockSpec((tk, fout_pad), lambda i, k: (k, 0)),           # H_neigh chunk
                    pl.BlockSpec((tn, fin_pad), lambda i, k: (i, 0)),            # X rows
                    _invariant_spec((fin_pad, fout_pad), lambda i, k: (0, 0)),   # W_self
                    pl.BlockSpec((tn, 1), lambda i, k: (i, 0)),                  # 1/deg rows
                    _invariant_spec((1, fout_pad), lambda i, k: (0, 0)),         # BN scale
                    _invariant_spec((1, fout_pad), lambda i, k: (0, 0)),         # BN shift
                ],
                out_specs=pl.BlockSpec((tn, fout_pad), lambda i, k: (i, 0)),
                scratch_shapes=[pltpu.VMEM((tn, fout_pad), jnp.float32)],
            ),
            compiler_params=cparams_2d,
        )(a_i8, hn, x, w_self, deg_inv, bn_scale, bn_shift)
    return y


# ----------------------------------------------------------------------------
# Parameters + full forward
# ----------------------------------------------------------------------------
def init_graphsage_params(key, in_feats, hidden_feats, out_feats, num_layers):
    """Deterministic Xavier-ish init matching the module's parameter shapes."""
    dims = [in_feats] + [hidden_feats] * (num_layers - 1) + [out_feats]
    w_self, w_neigh, bn_scale, bn_shift = [], [], [], []
    eps = 1e-5
    for li in range(num_layers):
        fin, fout = dims[li], dims[li + 1]
        key, k1, k2 = jax.random.split(key, 3)
        bound = (6.0 / (fin + fout)) ** 0.5
        # Stored as (Fin, Fout) so y = x @ W (== x @ W_torch.T).
        w_self.append(jax.random.uniform(k1, (fin, fout), jnp.float32, -bound, bound))
        w_neigh.append(jax.random.uniform(k2, (fin, fout), jnp.float32, -bound, bound))
        if li < num_layers - 1:
            # BatchNorm1d default init: gamma=1, beta=0, running_mean=0, running_var=1.
            gamma = jnp.ones((1, fout), jnp.float32)
            beta = jnp.zeros((1, fout), jnp.float32)
            r_mean = jnp.zeros((1, fout), jnp.float32)
            r_var = jnp.ones((1, fout), jnp.float32)
            scale = gamma / jnp.sqrt(r_var + eps)
            shift = beta - r_mean * scale
            bn_scale.append(scale)
            bn_shift.append(shift)
    return dict(w_self=w_self, w_neigh=w_neigh, bn_scale=bn_scale, bn_shift=bn_shift)


def graphsage_forward(adj, x, params, out_feats, *,
                      force_kstream=False, tn_override=None, tk_override=None):
    """Full GraphSAGE forward.

    adj: (N, N) 0/1 adjacency (adj[i, j] = 1 iff edge j -> i); x: (N, Fin) f32.
    """
    n = x.shape[0]
    num_layers = len(params["w_self"])

    # One-time prep: adjacency as int8 0/1 padded to 128-aligned (N_pad, N_pad);
    # exact f32 per-row 1/in_deg; bf16 node features.
    a_i8 = _pad2(adj.astype(jnp.int8), LANE, LANE)
    n_pad = a_i8.shape[0]
    in_deg = jnp.sum(adj.astype(jnp.float32), axis=1, keepdims=True)
    deg_inv = 1.0 / jnp.maximum(in_deg, 1.0)
    deg_inv = jnp.pad(deg_inv, ((0, n_pad - n), (0, 0)), constant_values=1.0)
    h = _pad2(x.astype(jnp.float32), LANE, LANE).astype(jnp.bfloat16)

    for li in range(num_layers):
        last = li == num_layers - 1
        ws = _pad2(params["w_self"][li], LANE, LANE).astype(jnp.bfloat16)
        wn = _pad2(params["w_neigh"][li], LANE, LANE).astype(jnp.bfloat16)
        fout_pad = ws.shape[1]
        if not last:
            sc = _pad_cols(params["bn_scale"][li], LANE, value=1.0)
            sh = _pad_cols(params["bn_shift"][li], LANE, value=0.0)
            mode, valid_cols, out_dtype = "hidden", fout_pad, jnp.bfloat16
        else:
            sc = jnp.ones((1, fout_pad), jnp.float32)    # unused in "output" mode
            sh = jnp.zeros((1, fout_pad), jnp.float32)
            mode, valid_cols, out_dtype = "output", out_feats, jnp.float32
        h = sage_layer(a_i8, deg_inv, h, ws, wn, sc, sh,
                       mode=mode, valid_cols=valid_cols, out_dtype=out_dtype,
                       force_kstream=force_kstream, tn=tn_override, tk=tk_override)
    return h[:n, :out_feats]


def _jax_reference(adj, x, params, out_feats):
    """Pure-JAX reference with the same mixed-precision casting points."""
    deg = jnp.maximum(jnp.sum(adj.astype(jnp.float32), axis=1, keepdims=True), 1.0)
    dinv = 1.0 / deg
    a_bf = adj.astype(jnp.float32).astype(jnp.bfloat16)
    h = x.astype(jnp.bfloat16)
    num_layers = len(params["w_self"])
    y = None
    for li in range(num_layers):
        ws = params["w_self"][li].astype(jnp.bfloat16)
        wn = params["w_neigh"][li].astype(jnp.bfloat16)
        hn = jnp.dot(h, wn, preferred_element_type=jnp.float32).astype(jnp.bfloat16)
        neigh = jnp.dot(a_bf, hn, preferred_element_type=jnp.float32) * dinv
        y = jnp.dot(h, ws, preferred_element_type=jnp.float32) + neigh
        if li < num_layers - 1:
            y = y * params["bn_scale"][li] + params["bn_shift"][li]
            y = jnp.maximum(y, 0.0)
            h = y.astype(jnp.bfloat16)
        else:
            y = jax.nn.log_softmax(y, axis=-1)
    return y


if __name__ == "__main__":
    # Small synthetic "arxiv-like" setup (N padded to 256 so the K-streaming
    # path can be exercised with 2 source chunks).
    N = 200
    in_feats = 48
    hidden_feats = 64
    out_feats = 40
    num_layers = 3
    # dropout p = 0.5 -> identity in eval mode

    key = jax.random.PRNGKey(0)
    key, k_adj, k_x, k_w = jax.random.split(key, 4)

    # Deterministic random graph: edge j -> i with prob 0.05.  No forced
    # self-loops: DGL's 'mean' aggregates in-neighbors only; fc_self handles
    # the node's own features.  Zero in-degree rows get a zero neighbor mean.
    adj = (jax.random.uniform(k_adj, (N, N)) < 0.05).astype(jnp.float32)
    x = jax.random.normal(k_x, (N, in_feats), jnp.float32)
    params = init_graphsage_params(k_w, in_feats, hidden_feats, out_feats, num_layers)

    # Default (resident H_neigh) path.
    out_res = jax.block_until_ready(graphsage_forward(adj, x, params, out_feats))

    # Forced K-streaming path (2-D grid, f32 accumulator) — cross-check.
    out_ks = jax.block_until_ready(
        graphsage_forward(adj, x, params, out_feats,
                          force_kstream=True, tn_override=128, tk_override=128))

    ref = _jax_reference(adj, x, params, out_feats)

    assert out_res.shape == (N, out_feats)
    assert bool(jnp.all(jnp.isfinite(out_res)))
    # log_softmax rows should sum to ~1 after exp.
    row_sums = jnp.sum(jnp.exp(out_res), axis=-1)
    assert bool(jnp.all(jnp.abs(row_sums - 1.0) < 1e-3))
    # Both Pallas paths agree, and both agree with the like-for-like JAX reference.
    assert bool(jnp.max(jnp.abs(out_res - out_ks)) < 5e-3)
    assert bool(jnp.max(jnp.abs(out_res - jnp.asarray(ref))) < 2e-2)

    print("KERNEL_OK")
</pallas_src>

<mosaic_0001>
module attributes {stable_mosaic.version = 11 : i64} {
  func.func @k(%arg0: i32, %arg1: memref<8x128xf32, #tpu.memory_space<vmem>>, %arg2: memref<8x128xf32, #tpu.memory_space<vmem>>) attributes {dimension_semantics = [#tpu.dimension_semantics<arbitrary>], iteration_bounds = array<i64: 1>, scalar_prefetch = 0 : i64, scratch_operands = 0 : i64, tpu.core_type = #tpu.core_type<tc>, window_params = [{pipeline_mode = #tpu.pipeline_mode<synchronous>, transform_indices = @transform_0, window_bounds = array<i64: 8, 128>}, {pipeline_mode = #tpu.pipeline_mode<synchronous>, transform_indices = @transform_1, window_bounds = array<i64: 8, 128>}]} {
    %c0 = arith.constant 0 : index
    %c0_0 = arith.constant 0 : index
    %0 = vector.load %arg1[%c0, %c0_0] : memref<8x128xf32, #tpu.memory_space<vmem>>, vector<8x128xf32>
    %c0_1 = arith.constant 0 : index
    %c0_2 = arith.constant 0 : index
    %1 = vector.load %arg2[%c0_1, %c0_2] : memref<8x128xf32, #tpu.memory_space<vmem>>, vector<8x128xf32>
    tpu.vector_store %arg2[%c0_1, %c0_2], %0 {strides = array<i32>} : memref<8x128xf32, #tpu.memory_space<vmem>>, vector<8x128xf32>,
    return
  }
  func.func @transform_0(%arg0: i32) -> (i32, i32) {
    %c0_i32 = arith.constant 0 : i32
    %c0_i32_0 = arith.constant 0 : i32
    %c0_i32_1 = arith.constant 0 : i32
    return %c0_i32, %c0_i32_0 : i32, i32
  }
  func.func @transform_1(%arg0: i32) -> (i32, i32) {
    %c0_i32 = arith.constant 0 : i32
    %c0_i32_0 = arith.constant 0 : i32
    %c0_i32_1 = arith.constant 0 : i32
    return %c0_i32, %c0_i32_0 : i32, i32
  }
}

module attributes {stable_mosaic.version = 11 : i64} {
  func.func @_sage_project_kernel(%arg0: i32, %arg1: memref<128x128xbf16, #tpu.memory_space<vmem>>, %arg2: memref<128x128xbf16, #tpu.memory_space<vmem>>, %arg3: memref<128x128xbf16, #tpu.memory_space<vmem>>) attributes {dimension_semantics = [#tpu.dimension_semantics<parallel>], iteration_bounds = array<i64: 2>, scalar_prefetch = 0 : i64, scratch_operands = 0 : i64, tpu.core_type = #tpu.core_type<tc>, window_params = [{transform_indices = @transform_0, window_bounds = array<i64: 128, 128>}, {pipeline_mode = #tpu.pipeline_mode<synchronous>, transform_indices = @transform_1, window_bounds = array<i64: 128, 128>}, {transform_indices = @transform_2, window_bounds = array<i64: 128, 128>}]} {
    %c0 = arith.constant 0 : index
    %c0_0 = arith.constant 0 : index
    %0 = vector.load %arg1[%c0, %c0_0] : memref<128x128xbf16, #tpu.memory_space<vmem>>, vector<128x128xbf16>
    %c0_1 = arith.constant 0 : index
    %c0_2 = arith.constant 0 : index
    %1 = vector.load %arg2[%c0_1, %c0_2] : memref<128x128xbf16, #tpu.memory_space<vmem>>, vector<128x128xbf16>
    %cst = arith.constant dense<0.000000e+00> : vector<128x128xf32>
    %2 = tpu.matmul %0, %1, %cst {dimension_numbers = #tpu.dot_dimension_numbers<[1], [0], [0], [1], [0, 0, 1, 1], [], []>} : vector<128x128xbf16>, vector<128x128xbf16>, vector<128x128xf32> -> vector<128x128xf32>
    %3 = arith.truncf %2 : vector<128x128xf32> to vector<128x128xbf16>
    %c0_3 = arith.constant 0 : index
    %c0_4 = arith.constant 0 : index
    %4 = vector.load %arg3[%c0_3, %c0_4] : memref<128x128xbf16, #tpu.memory_space<vmem>>, vector<128x128xbf16>
    tpu.vector_store %arg3[%c0_3, %c0_4], %3 {strides = array<i32>} : memref<128x128xbf16, #tpu.memory_space<vmem>>, vector<128x128xbf16>,
    return
  }
  func.func @transform_0(%arg0: i32) -> (i32, i32) {
    %c0_i32 = arith.constant 0 : i32
    %c0_i32_0 = arith.constant 0 : i32
    return %arg0, %c0_i32 : i32, i32
  }
  func.func @transform_1(%arg0: i32) -> (i32, i32) {
    %c0_i32 = arith.constant 0 : i32
    %c0_i32_0 = arith.constant 0 : i32
    %c0_i32_1 = arith.constant 0 : i32
    return %c0_i32, %c0_i32_0 : i32, i32
  }
  func.func @transform_2(%arg0: i32) -> (i32, i32) {
    %c0_i32 = arith.constant 0 : i32
    %c0_i32_0 = arith.constant 0 : i32
    return %arg0, %c0_i32 : i32, i32
  }
}

</mosaic_0001>

<bundles_post_ra>
// kernel: tpu_custom_call.1
= control target key start
LH: loop header
LB: loop body
LE: loop exit
PB: predicated region body
PF: predicated region fallthrough
CT: control target
= control target key end

     0   :  { %6 = vsyncpa [#allocation3], 0  ;;  %s124_s0 = inlined_call_operand.hbm [shape: f32[8,128], index: 0, kind: input, shape index: {}]   ;;  %s125_s1 = inlined_call_operand.hbm [shape: f32[8,128], index: 1, kind: output, shape index: {}]  }
   0x1   :  { %7 = vsyncpa [#allocation4], 0  ;;  %s88_s6 = smov [#allocation2]   ;;  %s40_s10 = scalar_lea.hbm %s124_s0, 128 }
   0x2   :  { %s14_s7 = sshll.u32 %s88_s6, 4  ;;  %p41_p0 = scmp.ne.s32.totalorder %s124_s0, %s40_s10  ;;  %s15_s7 = int_to_ptr.vmem [resolvable:$true] %s14_s7 }
   0x3   :  { %p44_p1 = scmp.lt.u32.totalorder %s40_s10, %s124_s0 }
   0x5   :  { %p46_p2 = pnand %p44_p1, %p41_p0 }
   0x7   :  { %49 = shalt.err (!%p46_p2)
}
   0x8   :  { %s50_s15 = scalar_lea.vmem %s15_s7, 128  ;;  %p55_p4 = scmp.lt.s32.totalorder %s15_s7, %s15_s7 }
   0x9   :  { %p51_p3 = scmp.ne.s32.totalorder %s15_s7, %s50_s15  ;;  %p56_p5 = scmp.lt.s32.totalorder %s50_s15, %s50_s15 }
   0xb   :  { %p57_p6 = por %p56_p5, %p55_p4 }
   0xd   :  { %p58_p7 = pnand %p57_p6, %p51_p3 }
   0xf   :  { %61 = shalt.err (!%p58_p7)
}
  0x10   :  { %17 = dma.hbm_to_vmem [thread:$0]  %s124_s0, 128, %s15_s7, [#allocation3]  }
  0x11   :  { %84 = dma.done.wait [#allocation3], 128  }
  0x12   :  { %85 = vsyncadd [#allocation3], 4294967168  ;;  %s89_s18 = smov [#allocation5]   ;;  %v21_v0 = vld [vmem:[#allocation2] sm:$0xff] }
  0x13   :  { %s29_s19 = sshll.u32 %s89_s18, 4  ;;  %22 = vst [vmem:[#allocation5] sm:$0xff] %v21_v0  ;;  %s30_s19 = int_to_ptr.vmem [resolvable:$true] %s29_s19 }
  0x14   :  { %s62_s20 = scalar_lea.vmem %s30_s19, 128  ;;  %p67_p9 = scmp.lt.s32.totalorder %s30_s19, %s30_s19 }
  0x15   :  { %p63_p8 = scmp.ne.s32.totalorder %s30_s19, %s62_s20  ;;  %p68_p10 = scmp.lt.s32.totalorder %s62_s20, %s62_s20 }
  0x17   :  { %p69_p11 = por %p68_p10, %p67_p9 }
  0x19   :  { %p70_p12 = pnand %p69_p11, %p63_p8 }
  0x1b   :  { %73 = shalt.err (!%p70_p12)
}
  0x1c   :  { %s74_s23 = scalar_lea.hbm %s125_s1, 128 }
  0x1d   :  { %p75_p13 = scmp.ne.s32.totalorder %s125_s1, %s74_s23  ;;  %p78_p0 = scmp.lt.u32.totalorder %s74_s23, %s125_s1 }
  0x1f   :  { %p80_p1 = pnand %p78_p0, %p75_p13 }
  0x21   :  { %83 = shalt.err (!%p80_p1)
}
  0x22   :  { %32 = dma.vmem_to_hbm [thread:$0]  %s30_s19, 128, %s125_s1, [#allocation4]  }
  0x23   :  { %86 = dma.done.wait [#allocation4], 128  }
  0x24   :  { %87 = vsyncadd [#allocation4], 4294967168 }
  0x25   :  { %36 = vsyncpa [#allocation3], 1 }
  0x26   :  { %37 = vsyncpa [#allocation4], 1 }

// kernel: tpu_custom_call.1
= control target key start
LH: loop header
LB: loop body
LE: loop exit
PB: predicated region body
PF: predicated region fallthrough
CT: control target
= control target key end

     0   :  { %7 = vsyncpa [#allocation3], 0  ;;  %s1209_s0 = inlined_call_operand.hbm [shape: bf16[256,128], index: 0, kind: input, shape index: {}]   ;;  %s1210_s1 = inlined_call_operand.hbm [shape: bf16[128,128], index: 1, kind: input, shape index: {}]   ;;  %s1211_s2 = inlined_call_operand.hbm [shape: bf16[256,128], index: 2, kind: output, shape index: {}]  }
   0x1   :  { %9 = vsyncpa [#allocation3 + $0x1], 0 }
   0x2   :  { %10 = vsyncpa [#allocation6], 0 }
   0x3   :  { %11 = vsyncpa [#allocation4], 0 }
   0x4   :  { %13 = vsyncpa [#allocation4 + $0x1], 0  ;;  %s988_s9 = smov 0   ;;  %s990_s10 = smov 0  }
   0x5   :  { %s992_s11 = smov 0   ;;  %s994_s12 = smov 0  }
   0x6 LB: > { %s1009_s13 = sadd.s32 4294967295, %s964_s12   ;;  %s582_s14 = sadd.s32 4294967294, %s964_s12   ;;  %s964_s12 = sphi %s994_s12, %s1231_s12   ;;  %s960_s11 = sphi %s992_s11, %s1230_s11   ;;  %s956_s10 = sphi %s990_s10, %s1229_s10   ;;  %s952_s9 = sphi %s988_s9, %s1228_s9  }
   0x7   : > { %p39_p0 = scmp.ne.s32.totalorder %s956_s10, %s952_s9  ;;  %p1212_p1 = scmp.eq.s32.totalorder %s1009_s13, 0 }
   0x8   : > { %p90_p3 = scmp.eq.s32.totalorder %s582_s14, 1  ;;  %p583_p5 = scmp.ge.s32.totalorder %s964_s12, 1 }
   0x9   : > { %p1018_p4 = por %p1212_p1, %p39_p0  ;;  %p97_p7 = scmp.lt.s32.totalorder %s964_s12, 3 }
   0xa   : > { %p1023_p6 = por %p90_p3, %p39_p0  ;;  %s966_s18 = smov [#allocation5]  }
   0xb   : > { %s1215_s15 = scalar_select %p1018_p4, 1, 0 }
   0xc   : > { %s1216_s16 = scalar_select %p1023_p6, 1, 0 }
   0xd   : > { %p1028_p8 = pnand %p583_p5, %p97_p7  ;;  %s109_s19 = sshll.u32 %s966_s18, 4  ;;  %s1032_s19 = int_to_ptr.vmem [resolvable:$true] %s109_s19 }
   0xe   : > { %s1044_s21 = sadd.s32 1, %s964_s12   ;;  %s26_s22 = sadd.s32 1, %s960_s11 }
   0xf   : > { %s1217_s17 = scalar_select %p1028_p8, 1, 0 }
  0x10   : > { %p767_p9 = pneg %p1028_p8  ;;  %s23_s23 = ssub.s32 %s964_s12, %s1044_s21 }
  0x11   : > { %s836_s26 = scalar_lea.hbm %s1210_s1, 1024 }
  0x12   : > { %p1039_p11 = pnand %p767_p9, %p1212_p1  ;;  %p837_p12 = scmp.ne.s32.totalorder %s1210_s1, %s836_s26 }
  0x13   : > { %p843_p5 = scmp.lt.u32.totalorder %s836_s26, %s1210_s1 }
  0x14   : > { %p838_p13 = pneg %p1039_p11 }
  0x16   : > { %p839_p0 = pnand %p838_p13, %p837_p12 }
  0x18   : > { %p840_p3 = pneg %p839_p0 }
  0x1a   : > { %p845_p7 = pnand %p843_p5, %p840_p3 }
  0x1c   : > { %848 = shalt.err (!%p845_p7)
}
  0x1d   : > { %s849_s3 = scalar_lea.vmem %s1032_s19, 1024  ;;  %p857_p2 = scmp.lt.s32.totalorder %s1032_s19, %s1032_s19 }
  0x1e   : > { %p850_p9 = scmp.ne.s32.totalorder %s1032_s19, %s849_s3  ;;  %p858_p6 = scmp.lt.s32.totalorder %s849_s3, %s849_s3 }
  0x20   : > { %p852_p10 = pnand %p850_p9, %p838_p13  ;;  %p859_p4 = por %p858_p6, %p857_p2 }
  0x22   : > { %p853_p1 = pneg %p852_p10 }
  0x24   : > { %p860_p8 = pnand %p859_p4, %p853_p1 }
  0x26   : > { %863 = shalt.err (!%p860_p8)
}
  0x27   : > { %s967_s4 = smov 64   ;;  %s968_s5 = smov 4  }
  0x28   : > { %770 = dma.hbm_to_vmem [thread:$0]  (!%p1039_p11), %s1210_s1, 1024, %s1032_s19, [#allocation6], %s967_s4, %s967_s4, %s968_s5  }
  0x29   : > { %p24_p1 = scmp.eq.s32.totalorder %s23_s23, 0  ;;  %p33_p2 = scmp.ne.s32.totalorder %s960_s11, %s956_s10 }
  0x2a   : > { %p34_p4 = scmp.eq.s32.totalorder %s964_s12, 0  ;;  %p780_p6 = scmp.lt.s32.totalorder %s964_s12, 2 }
  0x2b   : > { %s1078_s8 = scalar_select %p24_p1, %s960_s11, %s26_s22  }
  0x2c   : > { %p35_p8 = por %p34_p4, %p33_p2  ;;  %p1219_p10 = scmp.eq.s32.totalorder %s1009_s13, 1 }
  0x2d   : > { %s123_s18 = sand.u32 1, %s960_s11   ;;  %s630_s20 = sshll.u32 %s964_s12, 10 }
  0x2e   : > { %p1082_p12 = por %p1219_p10, %p33_p2  ;;  %s586_s24 = sshll.u32 %s123_s18, 6 }
  0x2f   : > { %s1091_s27 = scalar_lea.hbm %s1209_s0, %s630_s20  ;;  %s127_s19 = scalar_lea.vmem [#allocation2], %s586_s24 }
  0x30   : > { %s134_s22 = sshll.u32 %s127_s19, 4  ;;  %p1093_p11 = pnand %p780_p6, %p35_p8  ;;  %s1097_s22 = int_to_ptr.vmem [resolvable:$true] %s134_s22 }
  0x31   : > { %s1099_s28 = scalar_lea.sflag [#allocation3], %s123_s18  ;;  %s864_s29 = scalar_lea.hbm %s1091_s27, 1024 }
  0x32   : > { %p865_p13 = scmp.ne.s32.totalorder %s1091_s27, %s864_s29  ;;  %p866_p0 = pneg %p1093_p11 }
  0x33   : > { %s869_s6 = scalar_lea.hbm %s1209_s0, 2048  ;;  %p870_p7 = scmp.lt.u32.totalorder %s1091_s27, %s1209_s0 }
  0x34   : > { %p867_p3 = pnand %p866_p0, %p865_p13  ;;  %p871_p9 = scmp.lt.u32.totalorder %s869_s6, %s864_s29 }
  0x35   : > { %p873_p2 = scmp.lt.u32.totalorder %s864_s29, %s1091_s27 }
  0x36   : > { %p868_p5 = pneg %p867_p3  ;;  %p872_p1 = por %p871_p9, %p870_p7 }
  0x38   : > { %p874_p4 = por %p873_p2, %p872_p1 }
  0x3a   : > { %p875_p6 = pnand %p874_p4, %p868_p5 }
  0x3c   : > { %878 = shalt.err (!%p875_p6)
}
  0x3d   : > { %s879_s18 = scalar_lea.vmem %s1097_s22, 1024  ;;  %s969_s24 = smov [#allocation2]  }
  0x3e   : > { %p880_p8 = scmp.ne.s32.totalorder %s1097_s22, %s879_s18  ;;  %s884_s25 = sshll.u32 %s969_s24, 4  ;;  %s885_s25 = int_to_ptr.vmem [resolvable:$false] %s884_s25 }
  0x3f   : > { %s886_s26 = scalar_lea.vmem %s885_s25, 2048  ;;  %p887_p3 = scmp.lt.s32.totalorder %s1097_s22, %s885_s25 }
  0x40   : > { %p882_p10 = pnand %p880_p8, %p866_p0  ;;  %p888_p7 = scmp.lt.s32.totalorder %s886_s26, %s879_s18 }
  0x42   : > { %p883_p13 = pneg %p882_p10  ;;  %p889_p9 = por %p888_p7, %p887_p3 }
  0x44   : > { %p890_p1 = pnand %p889_p9, %p883_p13 }
  0x46   : > { %893 = shalt.err (!%p890_p1)
}
  0x47   : > { %774 = dma.hbm_to_vmem [thread:$0]  (!%p1093_p11), %s1091_s27, 1024, %s1097_s22, %s1099_s28, %s967_s4, %s967_s4, %s968_s5  }
  0x48   : > { %p1222_p0 = scmp.ne.s32.totalorder %s1217_s17, 0 }
  0x49   : > { %s1133_s19 = sand.u32 (!%p1222_p0), 1, %s956_s10   ;;  %p1223_p5 = scmp.ne.s32.totalorder (!%p1222_p0), %s1215_s15, 0 }
  0x4a   : > { %146 = sbr.rel (%p1222_p0) target bundleno = 358 (0x166), region = 28  ;;  %s590_s29 = sshll.u32 (!%p1222_p0), %s1133_s19, 6 }
  0x4b   : > { %s149_s30 = scalar_lea.sflag (!%p1222_p0), [#allocation3], %s1133_s19  ;;  %s1139_s23 = scalar_lea.vmem (!%p1222_p0), [#allocation2], %s590_s29 }
  0x51   : > { %939 = dma.done.wait (%p1223_p5), %s149_s30, 1024  }
  0x52   : > { %941 = vsyncadd (%p1223_p5), %s149_s30, 4294966272  ;;  %p1224_p11 = scmp.eq.s32.totalorder %s1009_s13, 0 }
  0x54   : > { %943 = dma.done.wait (%p1224_p11), [#allocation6], 1024   ;;  %p1225_p2 = pmov %p1224_p11 }
  0x55   : > { %v820_v0 = vld [vmem:[#allocation5] sm:$0xff]   ;;  %v821_v1 = vld [vmem:[#allocation5 + $0x8] sm:$0xff]   ;;  %v822_v2 = vld [vmem:[#allocation5 + $0x10] sm:$0xff]   ;;  %s176_s15 = scalar_lea.vmem [#allocation7], %s590_s29  ;;  %s647_s4 = sshll.u32 %s1009_s13, 10 }
  0x56   : > { %945 = vsyncadd (%p1225_p2), [#allocation6], 4294966272  ;;  %711 = vmatprep.subr.bf16.mxu0 %v820_v0  ;;  %743 = vmatprep.subr.bf16.mxu1 %v820_v0  ;;  %v823_v3 = vld [vmem:[#allocation5 + $0x18] sm:$0xff]   ;;  %v828_v4 = vld [vmem:[%s1139_s23] sm:$0xff]   ;;  %s499_s17 = sshll.u32 %s176_s15, 4  ;;  %s1165_s22 = scalar_lea.hbm %s1211_s2, %s647_s4  ;;  %s1160_s17 = int_to_ptr.vmem [resolvable:$true] %s499_s17 }
  0x57   : > { %712 = vmatpush3.bf16.msra.mxu0 %v820_v0  ;;  %751 = vmatpush3.bf16.msra.mxu1 %v820_v0  ;;  %v829_v5 = vld [vmem:[%s1139_s23 + $0x20] sm:$0xff]   ;;  %v825_v7 = vld [vmem:[#allocation5 + $0x28] sm:$0xff]   ;;  %v826_v8 = vld [vmem:[#allocation5 + $0x30] sm:$0xff]   ;;  %s486_s13 = scalar_lea.sflag [#allocation4], %s1133_s19  ;;  %s894_s28 = scalar_lea.vmem %s1160_s17, 1024 }
  0x58   : > { %713 = vmatprep.subr.bf16.mxu0 %v821_v1  ;;  %744 = vmatprep.subr.bf16.mxu1 %v821_v1  ;;  %v824_v6 = vld [vmem:[#allocation5 + $0x20] sm:$0xff]   ;;  %v827_v9 = vld [vmem:[#allocation5 + $0x38] sm:$0xff]   ;;  %v830_v10 = vld [vmem:[%s1139_s23 + $0x8] sm:$0xff]   ;;  %p895_p4 = scmp.ne.s32.totalorder %s1160_s17, %s894_s28  ;;  %s970_s3 = smov [#allocation7]  }
  0x59   : > { %727 = vmatprep.mubr.bf16.mxu0 %v828_v4  ;;  %735 = vmatprep.mubr.bf16.mxu1 %v829_v5  ;;  %v831_v11 = vld [vmem:[%s1139_s23 + $0x28] sm:$0xff]   ;;  %v832_v12 = vld [vmem:[%s1139_s23 + $0x10] sm:$0xff]   ;;  %v834_v14 = vld [vmem:[%s1139_s23 + $0x18] sm:$0xff]   ;;  %s898_s6 = sshll.u32 %s970_s3, 4  ;;  %s899_s6 = int_to_ptr.vmem [resolvable:$false] %s898_s6 }
  0x5a   : > { %v833_v13 = vld [vmem:[%s1139_s23 + $0x30] sm:$0xff]   ;;  %v835_v15 = vld [vmem:[%s1139_s23 + $0x38] sm:$0xff]   ;;  %p896_p6 = pnand %p895_p4, %p1082_p12  ;;  %s900_s7 = scalar_lea.vmem %s899_s6, 2048 }
  0x5b   : > { %714 = vmatpush3.bf16.msra.mxu0 %v821_v1  ;;  %752 = vmatpush3.bf16.msra.mxu1 %v821_v1  ;;  %p901_p10 = scmp.lt.s32.totalorder %s1160_s17, %s899_s6  ;;  %p902_p13 = scmp.lt.s32.totalorder %s900_s7, %s894_s28 }
  0x5c   : > { %715 = vmatprep.subr.bf16.mxu0 %v822_v2  ;;  %745 = vmatprep.subr.bf16.mxu1 %v822_v2  ;;  %p897_p8 = pneg %p896_p6 }
  0x5d   : > { %p903_p3 = por %p902_p13, %p901_p10 }
  0x5f   : > { %716 = vmatpush3.bf16.msra.mxu0 %v822_v2  ;;  %753 = vmatpush3.bf16.msra.mxu1 %v822_v2  ;;  %p904_p7 = pnand %p903_p3, %p897_p8 }
  0x60   : > { %717 = vmatprep.subr.bf16.mxu0 %v823_v3  ;;  %746 = vmatprep.subr.bf16.mxu1 %v823_v3 }
  0x63   : > { %718 = vmatpush3.bf16.msra.mxu0 %v823_v3  ;;  %754 = vmatpush3.bf16.msra.mxu1 %v823_v3 }
  0x64   : > { %719 = vmatprep.subr.bf16.mxu0 %v824_v6  ;;  %747 = vmatprep.subr.bf16.mxu1 %v824_v6 }
  0x67   : > { %720 = vmatpush3.bf16.msra.mxu0 %v824_v6  ;;  %755 = vmatpush3.bf16.msra.mxu1 %v824_v6 }
  0x68   : > { %721 = vmatprep.subr.bf16.mxu0 %v825_v7  ;;  %748 = vmatprep.subr.bf16.mxu1 %v825_v7 }
  0x6b   : > { %722 = vmatpush3.bf16.msra.mxu0 %v825_v7  ;;  %756 = vmatpush3.bf16.msra.mxu1 %v825_v7 }
  0x6c   : > { %723 = vmatprep.subr.bf16.mxu0 %v826_v8  ;;  %749 = vmatprep.subr.bf16.mxu1 %v826_v8 }
  0x6f   : > { %724 = vmatpush3.bf16.msra.mxu0 %v826_v8  ;;  %757 = vmatpush3.bf16.msra.mxu1 %v826_v8 }
  0x70   : > { %725 = vmatprep.subr.bf16.mxu0 %v827_v9  ;;  %750 = vmatprep.subr.bf16.mxu1 %v827_v9 }
  0x73   : > { %726 = vmatpush3.bf16.msra.mxu0 %v827_v9  ;;  %758 = vmatpush3.bf16.msra.mxu1 %v827_v9 }
  0x76   : > { %728 = vmatmul.mubr.bf16.vlgmr.msra.gmra.mrb[0].mxu0 %v830_v10  ;;  %736 = vmatmul.mubr.bf16.vlgmr.msra.gmra.mrb[0].mxu1 %v831_v11 }
  0x77   : > { %731 = vmatprep.mubr.bf16.mxu0 %v832_v12  ;;  %739 = vmatprep.mubr.bf16.mxu1 %v833_v13 }
  0x7e   : > { %732 = vmatmul.mubr.bf16.gmra.mrb[4].mxu0 %v834_v14  ;;  %740 = vmatmul.mubr.bf16.gmra.mrb[4].mxu1 %v835_v15 }
 0x149   : > { %v729_v16 = vpop.f32.mrb[0].mxu0  ;;  %v737_v17 = vpop.f32.mrb[0].mxu1 }
 0x14a   : > { %v342_v18 = vpop.f32.mrb[1].mxu0  ;;  %v374_v19 = vpop.f32.mrb[1].mxu1 }
 0x14b   : > { %v730_v20 = vpop.f32.mrb[2].mxu0  ;;  %v738_v21 = vpop.f32.mrb[2].mxu1 }
 0x14c   : > { %v656_v22 = vpack.c.bf16 %v730_v20, %v729_v16  ;;  %v676_v23 = vpack.c.bf16 %v738_v21, %v737_v17  ;;  %v345_v24 = vpop.f32.mrb[3].mxu0  ;;  %v377_v25 = vpop.f32.mrb[3].mxu1 }
 0x14d   : > { %v651_v26 = vpack.c.bf16 %v345_v24, %v342_v18  ;;  %v671_v27 = vpack.c.bf16 %v377_v25, %v374_v19 }
 0x14e   : > { %688 = vst [vmem:[%s176_s15 + $0x8] sm:$0xff] %v656_v22   ;;  %692 = vst [vmem:[%s176_s15 + $0x28] sm:$0xff] %v676_v23  }
 0x14f   : > { %652 = vst [vmem:[%s176_s15] sm:$0xff] %v651_v26   ;;  %691 = vst [vmem:[%s176_s15 + $0x20] sm:$0xff] %v671_v27  }
 0x151   : > { %v733_v28 = vpop.f32.mrb[4].mxu0  ;;  %v741_v29 = vpop.f32.mrb[4].mxu1 }
 0x152   : > { %v358_v30 = vpop.f32.mrb[5].mxu0  ;;  %v390_v31 = vpop.f32.mrb[5].mxu1 }
 0x153   : > { %v734_v32 = vpop.f32.mrb[6].mxu0  ;;  %v742_v33 = vpop.f32.mrb[6].mxu1 }
 0x154   : > { %v666_v34 = vpack.c.bf16 %v734_v32, %v733_v28  ;;  %v686_v35 = vpack.c.bf16 %v742_v33, %v741_v29  ;;  %v361_v36 = vpop.f32.mrb[7].mxu0  ;;  %v393_v37 = vpop.f32.mrb[7].mxu1 }
 0x155   : > { %v661_v38 = vpack.c.bf16 %v361_v36, %v358_v30  ;;  %v681_v39 = vpack.c.bf16 %v393_v37, %v390_v31 }
 0x156   : > { %690 = vst [vmem:[%s176_s15 + $0x18] sm:$0xff] %v666_v34   ;;  %694 = vst [vmem:[%s176_s15 + $0x38] sm:$0xff] %v686_v35  }
 0x157   : > { %689 = vst [vmem:[%s176_s15 + $0x10] sm:$0xff] %v661_v38   ;;  %693 = vst [vmem:[%s176_s15 + $0x30] sm:$0xff] %v681_v39  }
 0x158   : > { %907 = shalt.err (!%p904_p7)
}
 0x159   : > { %s908_s20 = scalar_lea.hbm %s1165_s22, 1024  ;;  %s912_s25 = scalar_lea.hbm %s1211_s2, 2048 }
 0x15a   : > { %p909_p9 = scmp.ne.s32.totalorder %s1165_s22, %s908_s20  ;;  %p913_p5 = scmp.lt.u32.totalorder %s1165_s22, %s1211_s2 }
 0x15b   : > { %p914_p11 = scmp.lt.u32.totalorder %s912_s25, %s908_s20  ;;  %p916_p4 = scmp.lt.u32.totalorder %s908_s20, %s1165_s22 }
 0x15c   : > { %p910_p1 = pnand %p909_p9, %p1082_p12 }
 0x15d   : > { %p915_p2 = por %p914_p11, %p913_p5 }
 0x15e   : > { %p911_p0 = pneg %p910_p1 }
 0x15f   : > { %p917_p6 = por %p916_p4, %p915_p2 }
 0x161   : > { %p918_p8 = pnand %p917_p6, %p911_p0 }
 0x163   : > { %921 = shalt.err (!%p918_p8)
}
 0x164   : > { %s971_s30 = smov 64   ;;  %s972_s23 = smov 4  }
 0x165   : > { %765 = dma.vmem_to_hbm [thread:$0]  (%p1082_p12), %s1160_s17, 1024, %s1165_s22, %s486_s13, %s971_s30, %s971_s30, %s972_s23  }
 0x166 PF: > { %s514_s15 = sand.u32 1, %s952_s9   ;;  %p1226_p10 = scmp.ne.s32.totalorder %s1216_s16, 0 }
 0x167   : > { %p1227_p13 = scmp.ge.s32.totalorder %s964_s12, 2  ;;  %s515_s4 = scalar_lea.sflag [#allocation4], %s514_s15 }
 0x169   : > { %p776_p3 = pnand %p1227_p13, %p1226_p10 }
 0x16b   : > { %947 = dma.done.wait (!%p776_p3), %s515_s4, 1024  }
 0x16c   : > { %949 = vsyncadd (!%p776_p3), %s515_s4, 4294966272  ;;  %p16_p7 = scmp.ge.s32.totalorder %s1044_s21, 4   ;;  %s1228_s9 = smov %s956_s10 }
 0x16d   : > { %s1229_s10 = smov %s960_s11  ;;  %s1230_s11 = smov %s1078_s8 }
 0x16e   : > { %s1231_s12 = smov %s1044_s21  ;;  %18 = sbr.rel (!%p16_p7) target bundleno = 6 (0x6), region = 77 }
 0x175   :  { %520 = vsyncpa [#allocation3], 1 }
 0x176   :  { %522 = vsyncpa [#allocation3 + $0x1], 1 }
 0x177   :  { %523 = vsyncpa [#allocation6], 1 }
 0x178   :  { %524 = vsyncpa [#allocation4], 1 }
 0x179   :  { %526 = vsyncpa [#allocation4 + $0x1], 1 }

</bundles_post_ra>
